<compile_context>
chip_gen: v5e
topology: v5e:2x2
jax: 0.10.0
libtpu: 0.0.40
codegen_flags: <defaults>
</compile_context>

<pallas_src>
import functools

import jax
import jax.numpy as jnp
from jax.experimental import pallas as pl
from jax.experimental.pallas import tpu as pltpu


def _round_up(x, m):
    return ((x + m - 1) // m) * m


def _critic_kernel(xu_ref, w1_ref, b1_ref, w2_ref, b2_ref, w3_ref, b3_ref, o_ref):
    # Layer 1: relu( [x,u] @ W1 + b1 )   -- xu already concatenated + lane-padded.
    h1 = (
        jnp.dot(xu_ref[...], w1_ref[...], preferred_element_type=jnp.float32)
        + b1_ref[...]
    )
    h1 = jnp.maximum(h1, 0.0)

    # Layer 2: relu( h1 @ W2 + b2 )      (bf16 operands, f32 accumulation)
    h2 = (
        jnp.dot(h1.astype(w2_ref.dtype), w2_ref[...],
                preferred_element_type=jnp.float32)
        + b2_ref[...]
    )
    h2 = jnp.maximum(h2, 0.0)

    # Layer 3 (no activation): h2 @ W3 + b3 -- output columns lane-padded to 128.
    q = (
        jnp.dot(h2.astype(w3_ref.dtype), w3_ref[...],
                preferred_element_type=jnp.float32)
        + b3_ref[...]
    )
    o_ref[...] = q.astype(o_ref.dtype)


@functools.partial(jax.jit, static_argnames=("tile_m", "compute_dtype"))
def critic_forward(x, u, params, *, tile_m=512, compute_dtype=jnp.bfloat16):
    """Critic forward. x: (B, state_dim), u: (B, action_dim) -> (B, 1)."""
    w1, b1, w2, b2, w3, b3 = params            # weights (in, out); biases (1, out)
    B, state_dim = x.shape
    _, action_dim = u.shape
    in_dim = state_dim + action_dim
    h1_dim, h2_dim = w1.shape[1], w2.shape[1]  # 400, 300
    out_dim = w3.shape[1]                      # 1

    # ---- static tiling decisions ------------------------------------------
    pack = 16 if jnp.dtype(compute_dtype).itemsize < 4 else 8   # sublane pack
    k_pad = _round_up(in_dim, 128)             # lane-align layer-1 contraction
    h1_pad = _round_up(h1_dim, 128)            # 400 -> 512
    h2_pad = _round_up(h2_dim, 128)            # 300 -> 384
    n_pad = _round_up(out_dim, 128)            # lane-dense output slab

    b_aligned = _round_up(B, pack)
    tile_m = max(pack, min(tile_m, b_aligned))
    if b_aligned >= 512:
        # Keep tile_m a multiple of 256 (MXU height on v6e/v7x) and guarantee
        # >= 2 grid steps so the batch axis shards across both v7x TCs.
        tile_m = max(256, (tile_m // 256) * 256)
        half = (_round_up(B, 256) // 2 // 256) * 256
        if half >= 256:
            tile_m = min(tile_m, half)
    b_pad = _round_up(B, tile_m)

    # ---- wrapper-side layout prep (cheap, fused by XLA) ---------------------
    xu = jnp.concatenate([x, u], axis=1)
    xu = jnp.pad(xu, ((0, b_pad - B), (0, k_pad - in_dim))).astype(compute_dtype)

    # Zero-pad hidden dims; zero rows/cols keep the math exactly unchanged.
    w1p = jnp.pad(w1, ((0, k_pad - in_dim), (0, h1_pad - h1_dim))).astype(compute_dtype)
    w2p = jnp.pad(w2, ((0, h1_pad - h1_dim), (0, h2_pad - h2_dim))).astype(compute_dtype)
    w3p = jnp.pad(w3, ((0, h2_pad - h2_dim), (0, n_pad - out_dim))).astype(compute_dtype)
    b1p = jnp.pad(b1, ((0, 0), (0, h1_pad - h1_dim))).astype(jnp.float32)
    b2p = jnp.pad(b2, ((0, 0), (0, h2_pad - h2_dim))).astype(jnp.float32)
    b3p = jnp.pad(b3, ((0, 0), (0, n_pad - out_dim))).astype(jnp.float32)

    grid = (b_pad // tile_m,)

    def batch_spec(cols):
        return pl.BlockSpec((tile_m, cols), lambda i: (i, 0))

    def const_spec(shape):
        # Same block for every grid step -> pipeline skips redundant copies.
        return pl.BlockSpec(shape, lambda i: (0, 0))

    out_padded = pl.pallas_call(
        _critic_kernel,
        out_shape=jax.ShapeDtypeStruct((b_pad, n_pad), compute_dtype),
        grid_spec=pltpu.PrefetchScalarGridSpec(
            num_scalar_prefetch=0,
            grid=grid,
            in_specs=[
                batch_spec(k_pad),             # [x, u] tile       (tile_m, 128)
                const_spec(w1p.shape),         # W1                (128, 512)
                const_spec(b1p.shape),         # b1                (1, 512)
                const_spec(w2p.shape),         # W2                (512, 384)
                const_spec(b2p.shape),         # b2                (1, 384)
                const_spec(w3p.shape),         # W3 (lane-padded)  (384, 128)
                const_spec(b3p.shape),         # b3 (lane-padded)  (1, 128)
            ],
            out_specs=batch_spec(n_pad),       # (tile_m, 128) lane-dense output
        ),
        compiler_params=pltpu.CompilerParams(
            dimension_semantics=("parallel",),  # shards batch tiles across TCs (v7x)
        ),
    )(xu, w1p, b1p, w2p, b2p, w3p, b3p)

    return out_padded[:B, :out_dim].astype(x.dtype)


def init_critic_params(key, state_dim, action_dim, dtype=jnp.float32):
    """PyTorch nn.Linear-style init (U[-1/sqrt(fan_in), 1/sqrt(fan_in)]).

    Weights are returned transposed to (in_features, out_features); biases (1, out)."""
    dims = [(state_dim + action_dim, 400), (400, 300), (300, 1)]
    keys = jax.random.split(key, 2 * len(dims))
    params = []
    for li, (fan_in, fan_out) in enumerate(dims):
        bound = 1.0 / (fan_in ** 0.5)
        w = jax.random.uniform(keys[2 * li], (fan_in, fan_out), dtype,
                               minval=-bound, maxval=bound)
        b = jax.random.uniform(keys[2 * li + 1], (1, fan_out), dtype,
                               minval=-bound, maxval=bound)
        params += [w, b]
    return tuple(params)


def critic_reference(x, u, params):
    """Pure-JAX f32 reference matching the PyTorch forward."""
    w1, b1, w2, b2, w3, b3 = params
    xu = jnp.concatenate([x, u], axis=1)
    h = jax.nn.relu(xu @ w1 + b1)
    h = jax.nn.relu(h @ w2 + b2)
    return h @ w3 + b3


if __name__ == "__main__":
    state_dim, action_dim, batch = 16, 8, 16

    key = jax.random.PRNGKey(0)
    kx, ku, kp = jax.random.split(key, 3)
    x = jax.random.normal(kx, (batch, state_dim), jnp.float32)
    u = jax.random.normal(ku, (batch, action_dim), jnp.float32)
    params = init_critic_params(kp, state_dim, action_dim)

    ref = critic_reference(x, u, params)

    # Default (bf16 compute / bf16 writeback, f32 accumulation) path.
    out = jax.block_until_ready(critic_forward(x, u, params))
    assert out.shape == (batch, 1), out.shape
    assert jnp.allclose(out, ref, atol=2e-2, rtol=2e-2), (
        "bf16 kernel mismatch, max abs err = %f" % float(jnp.max(jnp.abs(out - ref))))

    # Full-f32 path for tight numerical validation of the kernel structure.
    out_f32 = jax.block_until_ready(
        critic_forward(x, u, params, compute_dtype=jnp.float32))
    assert jnp.allclose(out_f32, ref, atol=1e-5, rtol=1e-5), (
        "f32 kernel mismatch, max abs err = %f" % float(jnp.max(jnp.abs(out_f32 - ref))))

    # Non-multiple batch exercises the pack-aligned padding path.
    x2 = jax.random.normal(kx, (37, state_dim), jnp.float32)
    u2 = jax.random.normal(ku, (37, action_dim), jnp.float32)
    out2 = jax.block_until_ready(
        critic_forward(x2, u2, params, compute_dtype=jnp.float32))
    assert out2.shape == (37, 1), out2.shape
    assert jnp.allclose(out2, critic_reference(x2, u2, params), atol=1e-5, rtol=1e-5)

    print("KERNEL_OK")
</pallas_src>

<mosaic_0001>
module attributes {stable_mosaic.version = 11 : i64} {
  func.func @_critic_kernel(%arg0: i32, %arg1: memref<16x128xbf16, #tpu.memory_space<vmem>>, %arg2: memref<128x512xbf16, #tpu.memory_space<vmem>>, %arg3: memref<1x512xf32, #tpu.memory_space<vmem>>, %arg4: memref<512x384xbf16, #tpu.memory_space<vmem>>, %arg5: memref<1x384xf32, #tpu.memory_space<vmem>>, %arg6: memref<384x128xbf16, #tpu.memory_space<vmem>>, %arg7: memref<1x128xf32, #tpu.memory_space<vmem>>, %arg8: memref<16x128xbf16, #tpu.memory_space<vmem>>) attributes {dimension_semantics = [#tpu.dimension_semantics<parallel>], iteration_bounds = array<i64: 1>, scalar_prefetch = 0 : i64, scratch_operands = 0 : i64, tpu.core_type = #tpu.core_type<tc>, window_params = [{transform_indices = @transform_0, window_bounds = array<i64: 16, 128>}, {pipeline_mode = #tpu.pipeline_mode<synchronous>, transform_indices = @transform_1, window_bounds = array<i64: 128, 512>}, {pipeline_mode = #tpu.pipeline_mode<synchronous>, transform_indices = @transform_2, window_bounds = array<i64: 1, 512>}, {pipeline_mode = #tpu.pipeline_mode<synchronous>, transform_indices = @transform_3, window_bounds = array<i64: 512, 384>}, {pipeline_mode = #tpu.pipeline_mode<synchronous>, transform_indices = @transform_4, window_bounds = array<i64: 1, 384>}, {pipeline_mode = #tpu.pipeline_mode<synchronous>, transform_indices = @transform_5, window_bounds = array<i64: 384, 128>}, {pipeline_mode = #tpu.pipeline_mode<synchronous>, transform_indices = @transform_6, window_bounds = array<i64: 1, 128>}, {transform_indices = @transform_7, window_bounds = array<i64: 16, 128>}]} {
    %c0 = arith.constant 0 : index
    %c0_0 = arith.constant 0 : index
    %0 = vector.load %arg1[%c0, %c0_0] : memref<16x128xbf16, #tpu.memory_space<vmem>>, vector<16x128xbf16>
    %c0_1 = arith.constant 0 : index
    %c0_2 = arith.constant 0 : index
    %1 = vector.load %arg2[%c0_1, %c0_2] : memref<128x512xbf16, #tpu.memory_space<vmem>>, vector<128x512xbf16>
    %cst = arith.constant dense<0.000000e+00> : vector<16x512xf32>
    %2 = tpu.matmul %0, %1, %cst {dimension_numbers = #tpu.dot_dimension_numbers<[1], [0], [0], [1], [0, 0, 1, 1], [], []>} : vector<16x128xbf16>, vector<128x512xbf16>, vector<16x512xf32> -> vector<16x512xf32>
    %c0_3 = arith.constant 0 : index
    %c0_4 = arith.constant 0 : index
    %3 = vector.load %arg3[%c0_3, %c0_4] : memref<1x512xf32, #tpu.memory_space<vmem>>, vector<1x512xf32>
    %4 = vector.broadcast %3 : vector<1x512xf32> to vector<16x512xf32>
    %5 = arith.addf %2, %4 : vector<16x512xf32>
    %cst_5 = arith.constant 0.000000e+00 : f32
    %6 = vector.broadcast %cst_5 : f32 to vector<16x512xf32>
    %7 = arith.maximumf %5, %6 : vector<16x512xf32>
    %8 = arith.truncf %7 : vector<16x512xf32> to vector<16x512xbf16>
    %c0_6 = arith.constant 0 : index
    %c0_7 = arith.constant 0 : index
    %9 = vector.load %arg4[%c0_6, %c0_7] : memref<512x384xbf16, #tpu.memory_space<vmem>>, vector<512x384xbf16>
    %cst_8 = arith.constant dense<0.000000e+00> : vector<16x384xf32>
    %10 = tpu.matmul %8, %9, %cst_8 {dimension_numbers = #tpu.dot_dimension_numbers<[1], [0], [0], [1], [0, 0, 1, 1], [], []>} : vector<16x512xbf16>, vector<512x384xbf16>, vector<16x384xf32> -> vector<16x384xf32>
    %c0_9 = arith.constant 0 : index
    %c0_10 = arith.constant 0 : index
    %11 = vector.load %arg5[%c0_9, %c0_10] : memref<1x384xf32, #tpu.memory_space<vmem>>, vector<1x384xf32>
    %12 = vector.broadcast %11 : vector<1x384xf32> to vector<16x384xf32>
    %13 = arith.addf %10, %12 : vector<16x384xf32>
    %cst_11 = arith.constant 0.000000e+00 : f32
    %14 = vector.broadcast %cst_11 : f32 to vector<16x384xf32>
    %15 = arith.maximumf %13, %14 : vector<16x384xf32>
    %16 = arith.truncf %15 : vector<16x384xf32> to vector<16x384xbf16>
    %c0_12 = arith.constant 0 : index
    %c0_13 = arith.constant 0 : index
    %17 = vector.load %arg6[%c0_12, %c0_13] : memref<384x128xbf16, #tpu.memory_space<vmem>>, vector<384x128xbf16>
    %cst_14 = arith.constant dense<0.000000e+00> : vector<16x128xf32>
    %18 = tpu.matmul %16, %17, %cst_14 {dimension_numbers = #tpu.dot_dimension_numbers<[1], [0], [0], [1], [0, 0, 1, 1], [], []>} : vector<16x384xbf16>, vector<384x128xbf16>, vector<16x128xf32> -> vector<16x128xf32>
    %c0_15 = arith.constant 0 : index
    %c0_16 = arith.constant 0 : index
    %19 = vector.load %arg7[%c0_15, %c0_16] : memref<1x128xf32, #tpu.memory_space<vmem>>, vector<1x128xf32>
    %20 = vector.broadcast %19 : vector<1x128xf32> to vector<16x128xf32>
    %21 = arith.addf %18, %20 : vector<16x128xf32>
    %22 = arith.truncf %21 : vector<16x128xf32> to vector<16x128xbf16>
    %c0_17 = arith.constant 0 : index
    %c0_18 = arith.constant 0 : index
    %23 = vector.load %arg8[%c0_17, %c0_18] : memref<16x128xbf16, #tpu.memory_space<vmem>>, vector<16x128xbf16>
    tpu.vector_store %arg8[%c0_17, %c0_18], %22 {strides = array<i32>} : memref<16x128xbf16, #tpu.memory_space<vmem>>, vector<16x128xbf16>,
    return
  }
  func.func @transform_0(%arg0: i32) -> (i32, i32) {
    %c0_i32 = arith.constant 0 : i32
    %c0_i32_0 = arith.constant 0 : i32
    return %arg0, %c0_i32 : i32, i32
  }
  func.func @transform_1(%arg0: i32) -> (i32, i32) {
    %c0_i32 = arith.constant 0 : i32
    %c0_i32_0 = arith.constant 0 : i32
    %c0_i32_1 = arith.constant 0 : i32
    return %c0_i32, %c0_i32_0 : i32, i32
  }
  func.func @transform_2(%arg0: i32) -> (i32, i32) {
    %c0_i32 = arith.constant 0 : i32
    %c0_i32_0 = arith.constant 0 : i32
    %c0_i32_1 = arith.constant 0 : i32
    return %c0_i32, %c0_i32_0 : i32, i32
  }
  func.func @transform_3(%arg0: i32) -> (i32, i32) {
    %c0_i32 = arith.constant 0 : i32
    %c0_i32_0 = arith.constant 0 : i32
    %c0_i32_1 = arith.constant 0 : i32
    return %c0_i32, %c0_i32_0 : i32, i32
  }
  func.func @transform_4(%arg0: i32) -> (i32, i32) {
    %c0_i32 = arith.constant 0 : i32
    %c0_i32_0 = arith.constant 0 : i32
    %c0_i32_1 = arith.constant 0 : i32
    return %c0_i32, %c0_i32_0 : i32, i32
  }
  func.func @transform_5(%arg0: i32) -> (i32, i32) {
    %c0_i32 = arith.constant 0 : i32
    %c0_i32_0 = arith.constant 0 : i32
    %c0_i32_1 = arith.constant 0 : i32
    return %c0_i32, %c0_i32_0 : i32, i32
  }
  func.func @transform_6(%arg0: i32) -> (i32, i32) {
    %c0_i32 = arith.constant 0 : i32
    %c0_i32_0 = arith.constant 0 : i32
    %c0_i32_1 = arith.constant 0 : i32
    return %c0_i32, %c0_i32_0 : i32, i32
  }
  func.func @transform_7(%arg0: i32) -> (i32, i32) {
    %c0_i32 = arith.constant 0 : i32
    %c0_i32_0 = arith.constant 0 : i32
    return %arg0, %c0_i32 : i32, i32
  }
}

</mosaic_0001>

<bundles_post_ra>
// kernel: critic_forward.1
= control target key start
LH: loop header
LB: loop body
LE: loop exit
PB: predicated region body
PF: predicated region fallthrough
CT: control target
= control target key end

     0   :  { %s3066_s1 = inlined_call_operand.vmem [shape: bf16[128,512], index: 1, kind: input, shape index: {}]   ;;  %s3067_s3 = inlined_call_operand.vmem [shape: bf16[512,384], index: 3, kind: input, shape index: {}]   ;;  %s3068_s0 = inlined_call_operand.vmem [shape: bf16[16,128], index: 0, kind: input, shape index: {}]   ;;  %s3069_s2 = inlined_call_operand.vmem [shape: f32[1,512], index: 2, kind: input, shape index: {}]   ;;  %s3070_s5 = inlined_call_operand.vmem [shape: bf16[384,128], index: 5, kind: input, shape index: {}]   ;;  %s3071_s6 = inlined_call_operand.vmem [shape: f32[1,128], index: 6, kind: input, shape index: {}]   ;;  %s3072_s4 = inlined_call_operand.vmem [shape: f32[1,384], index: 4, kind: input, shape index: {}]   ;;  %s3073_s7 = inlined_call_operand.vmem [shape: bf16[16,128], index: 7, kind: output, shape index: {}]  }
   0x1   :  { %v1493_v0 = vld [vmem:[%s3066_s1 + $0xe0] sm:$0xf]  ;;  %v2018_v1 = vld [vmem:[%s3066_s1 + $0xec] sm:$0xf0]  ;;  %v2016_v2 = vld [vmem:[%s3066_s1 + $0xe4] sm:$0xf] }
   0x2   :  { %v1494_v3 = vor.u32 %v2018_v1, %v1493_v0  ;;  %v1495_v4 = vld [vmem:[%s3066_s1 + $0xf0] sm:$0xf0]  ;;  %v1501_v5 = vld [vmem:[%s3066_s1 + $0xe8] sm:$0xf]  ;;  %v2019_v6 = vld [vmem:[%s3066_s1 + $0xf4] sm:$0xf0] }
   0x3   :  { %v1498_v7 = vor.u32 %v2016_v2, %v1495_v4  ;;  %v1502_v8 = vor.u32 %v2019_v6, %v1501_v5  ;;  %v2017_v9 = vld [vmem:[%s3066_s1 + $0xec] sm:$0xf]  ;;  %v1503_v10 = vld [vmem:[%s3066_s1 + $0xf8] sm:$0xf0]  ;;  %v1477_v11 = vld [vmem:[%s3066_s1 + $0xc0] sm:$0xf] }
   0x4   :  { %236 = vmatpush.bf16.msra.mxu0 %v1494_v3  ;;  %v1506_v12 = vor.u32 %v2017_v9, %v1503_v10  ;;  %v2014_v13 = vld [vmem:[%s3066_s1 + $0xcc] sm:$0xf0]  ;;  %v2012_v14 = vld [vmem:[%s3066_s1 + $0xc4] sm:$0xf]  ;;  %v1479_v15 = vld [vmem:[%s3066_s1 + $0xd0] sm:$0xf0] }
   0x5   :  { %250 = vmatpush.bf16.msra.mxu1 %v1498_v7  ;;  %264 = vmatpush.bf16.msra.mxu2 %v1502_v8  ;;  %v1478_v16 = vor.u32 %v2014_v13, %v1477_v11  ;;  %v1482_v17 = vor.u32 %v2012_v14, %v1479_v15  ;;  %v1485_v18 = vld [vmem:[%s3066_s1 + $0xc8] sm:$0xf]  ;;  %v2015_v19 = vld [vmem:[%s3066_s1 + $0xd4] sm:$0xf0]  ;;  %v2013_v20 = vld [vmem:[%s3066_s1 + $0xcc] sm:$0xf] }
   0x6   :  { %278 = vmatpush.bf16.msra.mxu3 %v1506_v12  ;;  %v1486_v21 = vor.u32 %v2015_v19, %v1485_v18  ;;  %v1487_v22 = vld [vmem:[%s3066_s1 + $0xd8] sm:$0xf0]  ;;  %v1461_v23 = vld [vmem:[%s3066_s1 + $0xa0] sm:$0xf]  ;;  %v2010_v24 = vld [vmem:[%s3066_s1 + $0xac] sm:$0xf0] }
   0x7   :  { %v1490_v25 = vor.u32 %v2013_v20, %v1487_v22  ;;  %v2008_v26 = vld [vmem:[%s3066_s1 + $0xa4] sm:$0xf]  ;;  %v1463_v27 = vld [vmem:[%s3066_s1 + $0xb0] sm:$0xf0]  ;;  %v1469_v28 = vld [vmem:[%s3066_s1 + $0xa8] sm:$0xf]  ;;  %v1462_v29 = vor.u32 %v2010_v24, %v1461_v23 }
   0x8   :  { %237 = vmatpush.bf16.msra.mxu0 %v1478_v16  ;;  %v2011_v30 = vld [vmem:[%s3066_s1 + $0xb4] sm:$0xf0]  ;;  %v2009_v31 = vld [vmem:[%s3066_s1 + $0xac] sm:$0xf]  ;;  %v1471_v32 = vld [vmem:[%s3066_s1 + $0xb8] sm:$0xf0]  ;;  %v1466_v33 = vor.u32 %v2008_v26, %v1463_v27 }
   0x9   :  { %251 = vmatpush.bf16.msra.mxu1 %v1482_v17  ;;  %265 = vmatpush.bf16.msra.mxu2 %v1486_v21  ;;  %v1470_v34 = vor.u32 %v2011_v30, %v1469_v28  ;;  %v1445_v35 = vld [vmem:[%s3066_s1 + $0x80] sm:$0xf]  ;;  %v2006_v36 = vld [vmem:[%s3066_s1 + $0x8c] sm:$0xf0]  ;;  %v2004_v37 = vld [vmem:[%s3066_s1 + $0x84] sm:$0xf]  ;;  %v1474_v38 = vor.u32 %v2009_v31, %v1471_v32 }
   0xa   :  { %279 = vmatpush.bf16.msra.mxu3 %v1490_v25  ;;  %v1447_v39 = vld [vmem:[%s3066_s1 + $0x90] sm:$0xf0]  ;;  %v1453_v40 = vld [vmem:[%s3066_s1 + $0x88] sm:$0xf]  ;;  %v2007_v41 = vld [vmem:[%s3066_s1 + $0x94] sm:$0xf0]  ;;  %v1446_v44 = vor.u32 %v2006_v36, %v1445_v35 }
   0xb   :  { %v2005_v42 = vld [vmem:[%s3066_s1 + $0x8c] sm:$0xf]  ;;  %v1455_v43 = vld [vmem:[%s3066_s1 + $0x98] sm:$0xf0]  ;;  %v1450_v45 = vor.u32 %v2004_v37, %v1447_v39  ;;  %v1454_v46 = vor.u32 %v2007_v41, %v1453_v40  ;;  %v1429_v47 = vld [vmem:[%s3066_s1 + $0x60] sm:$0xf] }
   0xc   :  { %238 = vmatpush.bf16.msra.mxu0 %v1462_v29  ;;  %v2002_v48 = vld [vmem:[%s3066_s1 + $0x6c] sm:$0xf0]  ;;  %v2000_v49 = vld [vmem:[%s3066_s1 + $0x64] sm:$0xf]  ;;  %v1458_v50 = vor.u32 %v2005_v42, %v1455_v43  ;;  %v1431_v51 = vld [vmem:[%s3066_s1 + $0x70] sm:$0xf0] }
   0xd   :  { %252 = vmatpush.bf16.msra.mxu1 %v1466_v33  ;;  %266 = vmatpush.bf16.msra.mxu2 %v1470_v34  ;;  %v1437_v52 = vld [vmem:[%s3066_s1 + $0x68] sm:$0xf]  ;;  %v2003_v53 = vld [vmem:[%s3066_s1 + $0x74] sm:$0xf0]  ;;  %v2001_v54 = vld [vmem:[%s3066_s1 + $0x6c] sm:$0xf]  ;;  %v1430_v56 = vor.u32 %v2002_v48, %v1429_v47  ;;  %v1434_v57 = vor.u32 %v2000_v49, %v1431_v51 }
   0xe   :  { %280 = vmatpush.bf16.msra.mxu3 %v1474_v38  ;;  %v1439_v55 = vld [vmem:[%s3066_s1 + $0x78] sm:$0xf0]  ;;  %v1438_v58 = vor.u32 %v2003_v53, %v1437_v52  ;;  %v1413_v59 = vld [vmem:[%s3066_s1 + $0x40] sm:$0xf]  ;;  %v1998_v60 = vld [vmem:[%s3066_s1 + $0x4c] sm:$0xf0] }
   0xf   :  { %v1996_v61 = vld [vmem:[%s3066_s1 + $0x44] sm:$0xf]  ;;  %v1442_v62 = vor.u32 %v2001_v54, %v1439_v55  ;;  %v1415_v63 = vld [vmem:[%s3066_s1 + $0x50] sm:$0xf0]  ;;  %v1421_v0 = vld [vmem:[%s3066_s1 + $0x48] sm:$0xf]  ;;  %v1414_v4 = vor.u32 %v1998_v60, %v1413_v59 }
  0x10   :  { %239 = vmatpush.bf16.msra.mxu0 %v1446_v44  ;;  %v1999_v1 = vld [vmem:[%s3066_s1 + $0x54] sm:$0xf0]  ;;  %v1997_v2 = vld [vmem:[%s3066_s1 + $0x4c] sm:$0xf]  ;;  %v1423_v3 = vld [vmem:[%s3066_s1 + $0x58] sm:$0xf0]  ;;  %v1418_v5 = vor.u32 %v1996_v61, %v1415_v63 }
  0x11   :  { %253 = vmatpush.bf16.msra.mxu1 %v1450_v45  ;;  %267 = vmatpush.bf16.msra.mxu2 %v1454_v46  ;;  %v1422_v6 = vor.u32 %v1999_v1, %v1421_v0  ;;  %v1397_v7 = vld [vmem:[%s3066_s1 + $0x20] sm:$0xf]  ;;  %v1994_v8 = vld [vmem:[%s3066_s1 + $0x2c] sm:$0xf0]  ;;  %v1992_v9 = vld [vmem:[%s3066_s1 + $0x24] sm:$0xf]  ;;  %v1426_v10 = vor.u32 %v1997_v2, %v1423_v3 }
  0x12   :  { %281 = vmatpush.bf16.msra.mxu3 %v1458_v50  ;;  %v1399_v11 = vld [vmem:[%s3066_s1 + $0x30] sm:$0xf0]  ;;  %v1405_v12 = vld [vmem:[%s3066_s1 + $0x28] sm:$0xf]  ;;  %v1995_v13 = vld [vmem:[%s3066_s1 + $0x34] sm:$0xf0]  ;;  %v1398_v16 = vor.u32 %v1994_v8, %v1397_v7 }
  0x13   :  { %v1993_v14 = vld [vmem:[%s3066_s1 + $0x2c] sm:$0xf]  ;;  %v1407_v15 = vld [vmem:[%s3066_s1 + $0x38] sm:$0xf0]  ;;  %v1381_v17 = vld [vmem:[%s3066_s1] sm:$0xf]  ;;  %v1402_v18 = vor.u32 %v1992_v9, %v1399_v11  ;;  %v1406_v19 = vor.u32 %v1995_v13, %v1405_v12 }
  0x14   :  { %240 = vmatpush.bf16.msra.mxu0 %v1430_v56  ;;  %v1990_v20 = vld [vmem:[%s3066_s1 + $0xc] sm:$0xf0]  ;;  %v1988_v21 = vld [vmem:[%s3066_s1 + $0x4] sm:$0xf]  ;;  %v1383_v22 = vld [vmem:[%s3066_s1 + $0x10] sm:$0xf0]  ;;  %v1410_v23 = vor.u32 %v1993_v14, %v1407_v15 }
  0x15   :  { %254 = vmatpush.bf16.msra.mxu1 %v1434_v57  ;;  %268 = vmatpush.bf16.msra.mxu2 %v1438_v58  ;;  %v1389_v24 = vld [vmem:[%s3066_s1 + $0x8] sm:$0xf]  ;;  %v1991_v25 = vld [vmem:[%s3066_s1 + $0x14] sm:$0xf0]  ;;  %v1989_v26 = vld [vmem:[%s3066_s1 + $0xc] sm:$0xf]  ;;  %v1382_v30 = vor.u32 %v1990_v20, %v1381_v17  ;;  %v1386_v33 = vor.u32 %v1988_v21, %v1383_v22 }
  0x16   :  { %282 = vmatpush.bf16.msra.mxu3 %v1442_v62  ;;  %v1391_v27 = vld [vmem:[%s3066_s1 + $0x18] sm:$0xf0]  ;;  %v1593_v28 = vld [vmem:[%s3067_s3 + $0xa8] sm:$0xf]  ;;  %v2042_v29 = vld [vmem:[%s3067_s3 + $0xb0] sm:$0xf0]  ;;  %v1390_v34 = vor.u32 %v1991_v25, %v1389_v24 }
  0x17   :  { %v1689_v31 = vld [vmem:[%s3067_s3 + $0x168] sm:$0xf]  ;;  %v2066_v32 = vld [vmem:[%s3067_s3 + $0x170] sm:$0xf0]  ;;  %v1987_v35 = vld [vmem:[%s3068_s0] sm:$0xff]  ;;  %v1394_v36 = vor.u32 %v1989_v26, %v1391_v27  ;;  %v1594_v37 = vor.u32 %v2042_v29, %v1593_v28 }
  0x18   :  { %241 = vmatpush.bf16.msra.mxu0 %v1414_v4  ;;  %v1581_v38 = vld [vmem:[%s3067_s3 + $0x90] sm:$0xf]  ;;  %v1785_v39 = vld [vmem:[%s3067_s3 + $0x228] sm:$0xf]  ;;  %v2090_v40 = vld [vmem:[%s3067_s3 + $0x230] sm:$0xf0]  ;;  %v1690_v41 = vor.u32 %v2066_v32, %v1689_v31 }
  0x19   :  { %255 = vmatpush.bf16.msra.mxu1 %v1418_v5  ;;  %269 = vmatpush.bf16.msra.mxu2 %v1422_v6  ;;  %v2039_v42 = vld [vmem:[%s3067_s3 + $0x98] sm:$0xf0]  ;;  %v1881_v43 = vld [vmem:[%s3067_s3 + $0x2e8] sm:$0xf]  ;;  %v2114_v44 = vld [vmem:[%s3067_s3 + $0x2f0] sm:$0xf0]  ;;  %v1786_v47 = vor.u32 %v2090_v40, %v1785_v39 }
  0x1a   :  { %283 = vmatpush.bf16.msra.mxu3 %v1426_v10  ;;  %v1677_v45 = vld [vmem:[%s3067_s3 + $0x150] sm:$0xf]  ;;  %v2063_v46 = vld [vmem:[%s3067_s3 + $0x158] sm:$0xf0]  ;;  %v1582_v48 = vor.u32 %v2039_v42, %v1581_v38  ;;  %v1882_v49 = vor.u32 %v2114_v44, %v1881_v43  ;;  %v1569_v50 = vld [vmem:[%s3067_s3 + $0x78] sm:$0xf] }
  0x1b   :  { %v1773_v51 = vld [vmem:[%s3067_s3 + $0x210] sm:$0xf]  ;;  %v2087_v52 = vld [vmem:[%s3067_s3 + $0x218] sm:$0xf0]  ;;  %v1678_v53 = vor.u32 %v2063_v46, %v1677_v45  ;;  %v2036_v54 = vld [vmem:[%s3067_s3 + $0x80] sm:$0xf0] }
  0x1c   :  { %242 = vmatpush.bf16.msra.mxu0 %v1398_v16  ;;  %v1869_v55 = vld [vmem:[%s3067_s3 + $0x2d0] sm:$0xf]  ;;  %v2111_v56 = vld [vmem:[%s3067_s3 + $0x2d8] sm:$0xf0]  ;;  %v1665_v57 = vld [vmem:[%s3067_s3 + $0x138] sm:$0xf]  ;;  %v1774_v59 = vor.u32 %v2087_v52, %v1773_v51  ;;  %v1570_v60 = vor.u32 %v2036_v54, %v1569_v50 }
  0x1d   :  { %256 = vmatpush.bf16.msra.mxu1 %v1402_v18  ;;  %270 = vmatpush.bf16.msra.mxu2 %v1406_v19  ;;  %v2060_v58 = vld [vmem:[%s3067_s3 + $0x140] sm:$0xf0]  ;;  %v1870_v61 = vor.u32 %v2111_v56, %v1869_v55  ;;  %v1557_v62 = vld [vmem:[%s3067_s3 + $0x60] sm:$0xf]  ;;  %v1761_v63 = vld [vmem:[%s3067_s3 + $0x1f8] sm:$0xf] }
  0x1e   :  { %284 = vmatpush.bf16.msra.mxu3 %v1410_v23  ;;  %v2084_v0 = vld [vmem:[%s3067_s3 + $0x200] sm:$0xf0]  ;;  %v1666_v1 = vor.u32 %v2060_v58, %v1665_v57  ;;  %v2033_v2 = vld [vmem:[%s3067_s3 + $0x68] sm:$0xf0]  ;;  %v1857_v3 = vld [vmem:[%s3067_s3 + $0x2b8] sm:$0xf] }
  0x1f   :  { %v2108_v4 = vld [vmem:[%s3067_s3 + $0x2c0] sm:$0xf0]  ;;  %v1653_v5 = vld [vmem:[%s3067_s3 + $0x120] sm:$0xf]  ;;  %v2057_v6 = vld [vmem:[%s3067_s3 + $0x128] sm:$0xf0]  ;;  %v1762_v7 = vor.u32 %v2084_v0, %v1761_v63  ;;  %v1558_v8 = vor.u32 %v2033_v2, %v1557_v62 }
  0x20   :  { %243 = vmatpush.bf16.msra.mxu0 %v1382_v30  ;;  %v1858_v9 = vor.u32 %v2108_v4, %v1857_v3  ;;  %v1545_v10 = vld [vmem:[%s3067_s3 + $0x48] sm:$0xf]  ;;  %v1749_v11 = vld [vmem:[%s3067_s3 + $0x1e0] sm:$0xf]  ;;  %v2081_v12 = vld [vmem:[%s3067_s3 + $0x1e8] sm:$0xf0]  ;;  %v1654_v13 = vor.u32 %v2057_v6, %v1653_v5 }
  0x21   :  { %257 = vmatpush.bf16.msra.mxu1 %v1386_v33  ;;  %271 = vmatpush.bf16.msra.mxu2 %v1390_v34  ;;  %v2030_v14 = vld [vmem:[%s3067_s3 + $0x50] sm:$0xf0]  ;;  %v1845_v15 = vld [vmem:[%s3067_s3 + $0x2a0] sm:$0xf]  ;;  %v2105_v16 = vld [vmem:[%s3067_s3 + $0x2a8] sm:$0xf0]  ;;  %v1750_v19 = vor.u32 %v2081_v12, %v1749_v11 }
  0x22   :  { %285 = vmatpush.bf16.msra.mxu3 %v1394_v36  ;;  %v1641_v17 = vld [vmem:[%s3067_s3 + $0x108] sm:$0xf]  ;;  %v2054_v18 = vld [vmem:[%s3067_s3 + $0x110] sm:$0xf0]  ;;  %v1546_v20 = vor.u32 %v2030_v14, %v1545_v10  ;;  %v1846_v21 = vor.u32 %v2105_v16, %v1845_v15  ;;  %v1533_v22 = vld [vmem:[%s3067_s3 + $0x30] sm:$0xf] }
  0x23   :  { %244 = vmatmul.bf16.vlgmr.msra.gmra.mxu0 %v1987_v35  ;;  %v1737_v23 = vld [vmem:[%s3067_s3 + $0x1c8] sm:$0xf]  ;;  %v2078_v24 = vld [vmem:[%s3067_s3 + $0x1d0] sm:$0xf0]  ;;  %v1642_v25 = vor.u32 %v2054_v18, %v1641_v17  ;;  %v2027_v26 = vld [vmem:[%s3067_s3 + $0x38] sm:$0xf0] }
  0x24   :  { %952 = vmatpush.bf16.msrb.mxu0 %v1594_v37  ;;  %258 = vmatmul.bf16.vlgmr.msra.gmra.mxu1 %v1987_v35  ;;  %v1833_v27 = vld [vmem:[%s3067_s3 + $0x288] sm:$0xf]  ;;  %v2102_v28 = vld [vmem:[%s3067_s3 + $0x290] sm:$0xf0]  ;;  %v1629_v29 = vld [vmem:[%s3067_s3 + $0xf0] sm:$0xf]  ;;  %v1738_v31 = vor.u32 %v2078_v24, %v1737_v23  ;;  %v1534_v32 = vor.u32 %v2027_v26, %v1533_v22 }
  0x25   :  { %966 = vmatpush.bf16.msrb.mxu1 %v1690_v41  ;;  %272 = vmatmul.bf16.vlgmr.msra.gmra.mxu2 %v1987_v35  ;;  %v2051_v30 = vld [vmem:[%s3067_s3 + $0xf8] sm:$0xf0]  ;;  %v1834_v33 = vor.u32 %v2102_v28, %v1833_v27  ;;  %v1521_v34 = vld [vmem:[%s3067_s3 + $0x18] sm:$0xf]  ;;  %v2024_v38 = vld [vmem:[%s3067_s3 + $0x20] sm:$0xf0] }
  0x26   :  { %286 = vmatmul.bf16.vlgmr.msra.gmra.mxu3 %v1987_v35  ;;  %980 = vmatpush.bf16.msrb.mxu2 %v1786_v47  ;;  %v1725_v35 = vld [vmem:[%s3067_s3 + $0x1b0] sm:$0xf]  ;;  %v2075_v36 = vld [vmem:[%s3067_s3 + $0x1b8] sm:$0xf0]  ;;  %v1630_v37 = vor.u32 %v2051_v30, %v1629_v29  ;;  %v1617_v41 = vld [vmem:[%s3067_s3 + $0xd8] sm:$0xf]  ;;  %v1522_v45 = vor.u32 %v2024_v38, %v1521_v34 }
  0x27   :  { %994 = vmatpush.bf16.msrb.mxu3 %v1882_v49  ;;  %v1821_v39 = vld [vmem:[%s3067_s3 + $0x270] sm:$0xf]  ;;  %v2099_v40 = vld [vmem:[%s3067_s3 + $0x278] sm:$0xf0]  ;;  %v2048_v42 = vld [vmem:[%s3067_s3 + $0xe0] sm:$0xf0]  ;;  %v1726_v43 = vor.u32 %v2075_v36, %v1725_v35 }
  0x28   :  { %953 = vmatpush.bf16.msrb.mxu0 %v1582_v48  ;;  %v1509_v44 = vld [vmem:[%s3067_s3] sm:$0xf]  ;;  %v1822_v46 = vor.u32 %v2099_v40, %v1821_v39  ;;  %v2021_v47 = vld [vmem:[%s3067_s3 + $0x8] sm:$0xf0]  ;;  %v1713_v48 = vld [vmem:[%s3067_s3 + $0x198] sm:$0xf]  ;;  %v1618_v50 = vor.u32 %v2048_v42, %v1617_v41 }
  0x29   :  { %967 = vmatpush.bf16.msrb.mxu1 %v1678_v53  ;;  %v2072_v49 = vld [vmem:[%s3067_s3 + $0x1a0] sm:$0xf0]  ;;  %v1605_v51 = vld [vmem:[%s3067_s3 + $0xc0] sm:$0xf]  ;;  %v1809_v52 = vld [vmem:[%s3067_s3 + $0x258] sm:$0xf] }
  0x2a   :  { %981 = vmatpush.bf16.msrb.mxu2 %v1774_v59  ;;  %v2096_v53 = vld [vmem:[%s3067_s3 + $0x260] sm:$0xf0]  ;;  %v2045_v54 = vld [vmem:[%s3067_s3 + $0xc8] sm:$0xf0]  ;;  %v1595_v56 = vld [vmem:[%s3067_s3 + $0xb4] sm:$0xf0]  ;;  %v1714_v59 = vor.u32 %v2072_v49, %v1713_v48 }
  0x2b   :  { %995 = vmatpush.bf16.msrb.mxu3 %v1870_v61  ;;  %v2041_v55 = vld [vmem:[%s3067_s3 + $0xac] sm:$0xf]  ;;  %v1691_v58 = vld [vmem:[%s3067_s3 + $0x174] sm:$0xf0]  ;;  %v1810_v61 = vor.u32 %v2096_v53, %v1809_v52  ;;  %v2038_v62 = vld [vmem:[%s3067_s3 + $0x94] sm:$0xf]  ;;  %v1606_v2 = vor.u32 %v2045_v54, %v1605_v51 }
  0x2c   :  { %954 = vmatpush.bf16.msrb.mxu0 %v1570_v60  ;;  %v2065_v57 = vld [vmem:[%s3067_s3 + $0x16c] sm:$0xf]  ;;  %v1510_v60 = vor.u32 %v2021_v47, %v1509_v44  ;;  %v1701_v63 = vld [vmem:[%s3067_s3 + $0x180] sm:$0xf]  ;;  %v1598_v3 = vor.u32 %v2041_v55, %v1595_v56  ;;  %v1787_v6 = vld [vmem:[%s3067_s3 + $0x234] sm:$0xf0] }
  0x2d   :  { %968 = vmatpush.bf16.msrb.mxu1 %v1666_v1  ;;  %v2069_v0 = vld [vmem:[%s3067_s3 + $0x188] sm:$0xf0]  ;;  %v1797_v1 = vld [vmem:[%s3067_s3 + $0x240] sm:$0xf]  ;;  %v1883_v10 = vld [vmem:[%s3067_s3 + $0x2f4] sm:$0xf0] }
  0x2e   :  { %982 = vmatpush.bf16.msrb.mxu2 %v1762_v7  ;;  %v2093_v4 = vld [vmem:[%s3067_s3 + $0x248] sm:$0xf0]  ;;  %v1694_v7 = vor.u32 %v2065_v57, %v1691_v58  ;;  %v2062_v11 = vld [vmem:[%s3067_s3 + $0x154] sm:$0xf]  ;;  %v1679_v12 = vld [vmem:[%s3067_s3 + $0x15c] sm:$0xf0] }
  0x2f   :  { %996 = vmatpush.bf16.msrb.mxu3 %v1858_v9  ;;  %v2089_v5 = vld [vmem:[%s3067_s3 + $0x22c] sm:$0xf]  ;;  %v1798_v14 = vor.u32 %v2093_v4, %v1797_v1  ;;  %v2035_v18 = vld [vmem:[%s3067_s3 + $0x7c] sm:$0xf]  ;;  %v1571_v22 = vld [vmem:[%s3067_s3 + $0x84] sm:$0xf0] }
  0x30   :  { %955 = vmatpush.bf16.msrb.mxu0 %v1558_v8  ;;  %v1583_v8 = vld [vmem:[%s3067_s3 + $0x9c] sm:$0xf0]  ;;  %v2113_v9 = vld [vmem:[%s3067_s3 + $0x2ec] sm:$0xf]  ;;  %v1790_v15 = vor.u32 %v2089_v5, %v1787_v6  ;;  %v2110_v23 = vld [vmem:[%s3067_s3 + $0x2d4] sm:$0xf]  ;;  %v1574_v28 = vor.u32 %v2035_v18, %v1571_v22 }
  0x31   :  { %969 = vmatpush.bf16.msrb.mxu1 %v1654_v13  ;;  %v1702_v13 = vor.u32 %v2069_v0, %v1701_v63  ;;  %v1586_v16 = vor.u32 %v2038_v62, %v1583_v8  ;;  %v1886_v17 = vor.u32 %v2113_v9, %v1883_v10  ;;  %v1871_v24 = vld [vmem:[%s3067_s3 + $0x2dc] sm:$0xf0]  ;;  %v1667_v26 = vld [vmem:[%s3067_s3 + $0x144] sm:$0xf0]  ;;  %v1655_v34 = vld [vmem:[%s3067_s3 + $0x12c] sm:$0xf0] }
  0x32   :  { %983 = vmatpush.bf16.msrb.mxu2 %v1750_v19  ;;  %v2086_v19 = vld [vmem:[%s3067_s3 + $0x214] sm:$0xf]  ;;  %v1874_v29 = vor.u32 %v2110_v23, %v1871_v24  ;;  %v1763_v38 = vld [vmem:[%s3067_s3 + $0x204] sm:$0xf0]  ;;  %v2107_v39 = vld [vmem:[%s3067_s3 + $0x2bc] sm:$0xf] }
  0x33   :  { %997 = vmatpush.bf16.msrb.mxu3 %v1846_v21  ;;  %v1682_v21 = vor.u32 %v2062_v11, %v1679_v12  ;;  %v1859_v41 = vld [vmem:[%s3067_s3 + $0x2c4] sm:$0xf0]  ;;  %v1547_v44 = vld [vmem:[%s3067_s3 + $0x54] sm:$0xf0]  ;;  %v2080_v49 = vld [vmem:[%s3067_s3 + $0x1e4] sm:$0xf] }
  0x34   :  { %956 = vmatpush.bf16.msrb.mxu0 %v1546_v20  ;;  %v1775_v20 = vld [vmem:[%s3067_s3 + $0x21c] sm:$0xf0]  ;;  %v1862_v42 = vor.u32 %v2107_v39, %v1859_v41  ;;  %v1643_v47 = vld [vmem:[%s3067_s3 + $0x114] sm:$0xf0]  ;;  %v2104_v51 = vld [vmem:[%s3067_s3 + $0x2a4] sm:$0xf] }
  0x35   :  { %970 = vmatpush.bf16.msrb.mxu1 %v1642_v25  ;;  %v2059_v25 = vld [vmem:[%s3067_s3 + $0x13c] sm:$0xf]  ;;  %v1778_v27 = vor.u32 %v2086_v19, %v1775_v20  ;;  %v1847_v53 = vld [vmem:[%s3067_s3 + $0x2ac] sm:$0xf0]  ;;  %v2026_v55 = vld [vmem:[%s3067_s3 + $0x34] sm:$0xf] }
  0x36   :  { %984 = vmatpush.bf16.msrb.mxu2 %v1738_v31  ;;  %v1670_v30 = vor.u32 %v2059_v25, %v1667_v26  ;;  %v2032_v31 = vld [vmem:[%s3067_s3 + $0x64] sm:$0xf]  ;;  %v1850_v54 = vor.u32 %v2104_v51, %v1847_v53  ;;  %v1535_v56 = vld [vmem:[%s3067_s3 + $0x3c] sm:$0xf0]  ;;  %v2050_v57 = vld [vmem:[%s3067_s3 + $0xf4] sm:$0xf] }
  0x37   :  { %998 = vmatpush.bf16.msrb.mxu3 %v1834_v33  ;;  %v2056_v33 = vld [vmem:[%s3067_s3 + $0x124] sm:$0xf]  ;;  %v1538_v58 = vor.u32 %v2026_v55, %v1535_v56  ;;  %v1739_v62 = vld [vmem:[%s3067_s3 + $0x1d4] sm:$0xf0]  ;;  %v2101_v63 = vld [vmem:[%s3067_s3 + $0x28c] sm:$0xf] }
  0x38   :  { %957 = vmatpush.bf16.msrb.mxu0 %v1534_v32  ;;  %v1559_v32 = vld [vmem:[%s3067_s3 + $0x6c] sm:$0xf0]  ;;  %v1658_v36 = vor.u32 %v2056_v33, %v1655_v34  ;;  %v1835_v1 = vld [vmem:[%s3067_s3 + $0x294] sm:$0xf0]  ;;  %v1523_v4 = vld [vmem:[%s3067_s3 + $0x24] sm:$0xf0] }
  0x39   :  { %971 = vmatpush.bf16.msrb.mxu1 %v1630_v37  ;;  %v1562_v35 = vor.u32 %v2032_v31, %v1559_v32  ;;  %v2083_v37 = vld [vmem:[%s3067_s3 + $0x1fc] sm:$0xf]  ;;  %v2074_v9 = vld [vmem:[%s3067_s3 + $0x1b4] sm:$0xf]  ;;  %v1727_v10 = vld [vmem:[%s3067_s3 + $0x1bc] sm:$0xf0] }
  0x3a   :  { %985 = vmatpush.bf16.msrb.mxu2 %v1726_v43  ;;  %v1766_v40 = vor.u32 %v2083_v37, %v1763_v38  ;;  %v2029_v43 = vld [vmem:[%s3067_s3 + $0x4c] sm:$0xf]  ;;  %v2047_v5 = vld [vmem:[%s3067_s3 + $0xdc] sm:$0xf]  ;;  %v2098_v11 = vld [vmem:[%s3067_s3 + $0x274] sm:$0xf]  ;;  %v1730_v12 = vor.u32 %v2074_v9, %v1727_v10 }
  0x3b   :  { %999 = vmatpush.bf16.msrb.mxu3 %v1822_v46  ;;  %v1550_v46 = vor.u32 %v2029_v43, %v1547_v44  ;;  %v1607_v19 = vld [vmem:[%s3067_s3 + $0xcc] sm:$0xf0]  ;;  %v1715_v22 = vld [vmem:[%s3067_s3 + $0x1a4] sm:$0xf0]  ;;  %v2095_v23 = vld [vmem:[%s3067_s3 + $0x25c] sm:$0xf] }
  0x3c   :  { %958 = vmatpush.bf16.msrb.mxu0 %v1522_v45  ;;  %v2053_v45 = vld [vmem:[%s3067_s3 + $0x10c] sm:$0xf]  ;;  %v1811_v24 = vld [vmem:[%s3067_s3 + $0x264] sm:$0xf0]  ;;  %v1799_v31 = vld [vmem:[%s3067_s3 + $0x24c] sm:$0xf0] }
  0x3d   :  { %972 = vmatpush.bf16.msrb.mxu1 %v1618_v50  ;;  %v1646_v48 = vor.u32 %v2053_v45, %v1643_v47  ;;  %v1751_v50 = vld [vmem:[%s3067_s3 + $0x1ec] sm:$0xf0]  ;;  %v1814_v26 = vor.u32 %v2095_v23, %v1811_v24  ;;  %v60_v33 = vld [vmem:[%s3069_s2] sm:$0xf]  ;;  %v2043_v47 = vld [vmem:[%s3067_s3 + $0xb8] sm:$0xf0] }
  0x3e   :  { %986 = vmatpush.bf16.msrb.mxu2 %v1714_v59  ;;  %v1754_v52 = vor.u32 %v2080_v49, %v1751_v50  ;;  %v1631_v59 = vld [vmem:[%s3067_s3 + $0xfc] sm:$0xf0]  ;;  %v63_v37 = vperm.slane %v60_v33, 1  ;;  %v64_v49 = vperm.slane %v60_v33, 2  ;;  %v1697_v51 = vld [vmem:[%s3067_s3 + $0x170] sm:$0xf] }
  0x3f   :  { %1000 = vmatpush.bf16.msrb.mxu3 %v1810_v61  ;;  %v2077_v61 = vld [vmem:[%s3067_s3 + $0x1cc] sm:$0xf]  ;;  %v65_v53 = vperm.slane %v60_v33, 3  ;;  %v1781_v24 = vld [vmem:[%s3067_s3 + $0x218] sm:$0xf] }
  0x40   :  { %959 = vmatpush.bf16.msrb.mxu0 %v1510_v60  ;;  %v1634_v60 = vor.u32 %v2050_v57, %v1631_v59  ;;  %v1742_v0 = vor.u32 %v2077_v61, %v1739_v62  ;;  %v1589_v59 = vld [vmem:[%s3067_s3 + $0x98] sm:$0xf] }
  0x41   :  { %973 = vmatpush.bf16.msrb.mxu1 %v1606_v2  ;;  %v1838_v2 = vor.u32 %v2101_v63, %v1835_v1  ;;  %v1685_v63 = vld [vmem:[%s3067_s3 + $0x158] sm:$0xf] }
  0x42   :  { %987 = vmatpush.bf16.msrb.mxu2 %v1702_v13  ;;  %v1823_v13 = vld [vmem:[%s3067_s3 + $0x27c] sm:$0xf0] }
  0x43   :  { %1001 = vmatpush.bf16.msrb.mxu3 %v1798_v14  ;;  %v1826_v14 = vor.u32 %v2098_v11, %v1823_v13  ;;  %v2115_v11 = vld [vmem:[%s3067_s3 + $0x2f8] sm:$0xf0]  ;;  %v2037_v13 = vld [vmem:[%s3067_s3 + $0x88] sm:$0xf0] }
  0x44   :  { %1008 = vmatpush.bf16.msra.mxu0 %v1598_v3  ;;  %v2023_v3 = vld [vmem:[%s3067_s3 + $0x1c] sm:$0xf] }
  0x45   :  { %1022 = vmatpush.bf16.msra.mxu1 %v1694_v7  ;;  %v1526_v6 = vor.u32 %v2023_v3, %v1523_v4  ;;  %v1619_v7 = vld [vmem:[%s3067_s3 + $0xe4] sm:$0xf0] }
  0x46   :  { %1036 = vmatpush.bf16.msra.mxu2 %v1790_v15  ;;  %v1622_v8 = vor.u32 %v2047_v5, %v1619_v7  ;;  %v2020_v15 = vld [vmem:[%s3067_s3 + $0x4] sm:$0xf]  ;;  %v2091_v7 = vld [vmem:[%s3067_s3 + $0x238] sm:$0xf0] }
  0x47   :  { %1050 = vmatpush.bf16.msra.mxu3 %v1886_v17  ;;  %v2044_v17 = vld [vmem:[%s3067_s3 + $0xc4] sm:$0xf] }
  0x48   :  { %1009 = vmatpush.bf16.msra.mxu0 %v1586_v16  ;;  %v1511_v16 = vld [vmem:[%s3067_s3 + $0xc] sm:$0xf0]  ;;  %v1610_v20 = vor.u32 %v2044_v17, %v1607_v19  ;;  %v2061_v17 = vld [vmem:[%s3067_s3 + $0x148] sm:$0xf0] }
  0x49   :  { %1023 = vmatpush.bf16.msra.mxu1 %v1682_v21  ;;  %v1514_v18 = vor.u32 %v2020_v15, %v1511_v16  ;;  %v2071_v21 = vld [vmem:[%s3067_s3 + $0x19c] sm:$0xf]  ;;  %v1673_v16 = vld [vmem:[%s3067_s3 + $0x140] sm:$0xf] }
  0x4a   :  { %1037 = vmatpush.bf16.msra.mxu2 %v1778_v27  ;;  %v1718_v25 = vor.u32 %v2071_v21, %v1715_v22  ;;  %v2068_v27 = vld [vmem:[%s3067_s3 + $0x184] sm:$0xf] }
  0x4b   :  { %1051 = vmatpush.bf16.msra.mxu3 %v1874_v29 }
  0x4c   :  { %1010 = vmatpush.bf16.msra.mxu0 %v1574_v28  ;;  %v1703_v28 = vld [vmem:[%s3067_s3 + $0x18c] sm:$0xf0] }
  0x4d   :  { %1024 = vmatpush.bf16.msra.mxu1 %v1670_v30  ;;  %v1706_v29 = vor.u32 %v2068_v27, %v1703_v28  ;;  %v2092_v30 = vld [vmem:[%s3067_s3 + $0x244] sm:$0xf]  ;;  %v1674_v28 = vor.u32 %v2061_v17, %v1673_v16  ;;  %v1517_v16 = vld [vmem:[%s3067_s3 + $0x8] sm:$0xf]  ;;  %v2022_v17 = vld [vmem:[%s3067_s3 + $0x10] sm:$0xf0] }
  0x4e   :  { %1038 = vmatpush.bf16.msra.mxu2 %v1766_v40  ;;  %v1802_v32 = vor.u32 %v2092_v30, %v1799_v31  ;;  %v1565_v30 = vld [vmem:[%s3067_s3 + $0x68] sm:$0xf]  ;;  %v2034_v31 = vld [vmem:[%s3067_s3 + $0x70] sm:$0xf0] }
  0x4f   :  { %1052 = vmatpush.bf16.msra.mxu3 %v1862_v42 }
  0x50   :  { %1011 = vmatpush.bf16.msra.mxu0 %v1562_v35  ;;  %v62_v35 = vperm.slane %v60_v33, 0  ;;  %v2058_v33 = vld [vmem:[%s3067_s3 + $0x130] sm:$0xf0] }
  0x51   :  { %1025 = vmatpush.bf16.msra.mxu1 %v1658_v36 }
  0x52   :  { %1039 = vmatpush.bf16.msra.mxu2 %v1754_v52  ;;  %v2067_v52 = vld [vmem:[%s3067_s3 + $0x178] sm:$0xf0] }
  0x53   :  { %1053 = vmatpush.bf16.msra.mxu3 %v1850_v54 }
  0x54   :  { %1012 = vmatpush.bf16.msra.mxu0 %v1550_v46  ;;  %v1601_v46 = vld [vmem:[%s3067_s3 + $0xb0] sm:$0xf] }
  0x55   :  { %1026 = vmatpush.bf16.msra.mxu1 %v1646_v48  ;;  %v1602_v56 = vor.u32 %v2043_v47, %v1601_v46 }
  0x56   :  { %1040 = vmatpush.bf16.msra.mxu2 %v1742_v0  ;;  %v2064_v0 = vld [vmem:[%s3067_s3 + $0x160] sm:$0xf0] }
  0x57   :  { %1054 = vmatpush.bf16.msra.mxu3 %v1838_v2  ;;  %v1686_v10 = vor.u32 %v2064_v0, %v1685_v63  ;;  %v2079_v63 = vld [vmem:[%s3067_s3 + $0x1d8] sm:$0xf0] }
  0x58   :  { %1013 = vmatpush.bf16.msra.mxu0 %v1538_v58  ;;  %v1698_v58 = vor.u32 %v2067_v52, %v1697_v51  ;;  %v1853_v52 = vld [vmem:[%s3067_s3 + $0x2a8] sm:$0xf] }
  0x59   :  { %1027 = vmatpush.bf16.msra.mxu1 %v1634_v60  ;;  %v2040_v60 = vld [vmem:[%s3067_s3 + $0xa0] sm:$0xf0] }
  0x5a   :  { %1041 = vmatpush.bf16.msra.mxu2 %v1730_v12  ;;  %v1590_v5 = vor.u32 %v2040_v60, %v1589_v59  ;;  %v1577_v12 = vld [vmem:[%s3067_s3 + $0x80] sm:$0xf] }
  0x5b   :  { %1055 = vmatpush.bf16.msra.mxu3 %v1826_v14  ;;  %v1578_v23 = vor.u32 %v2037_v13, %v1577_v12 }
  0x5c   :  { %1014 = vmatpush.bf16.msra.mxu0 %v1526_v6  ;;  %v1793_v6 = vld [vmem:[%s3067_s3 + $0x230] sm:$0xf] }
  0x5d   :  { %1028 = vmatpush.bf16.msra.mxu1 %v1622_v8  ;;  %v1889_v8 = vld [vmem:[%s3067_s3 + $0x2f0] sm:$0xf] }
  0x5e   :  { %1042 = vmatpush.bf16.msra.mxu2 %v1718_v25  ;;  %v1890_v22 = vor.u32 %v2115_v11, %v1889_v8  ;;  %v2088_v25 = vld [vmem:[%s3067_s3 + $0x220] sm:$0xf0] }
  0x5f   :  { %1056 = vmatpush.bf16.msra.mxu3 %v1814_v26  ;;  %v1877_v26 = vld [vmem:[%s3067_s3 + $0x2d8] sm:$0xf]  ;;  %v2076_v11 = vld [vmem:[%s3067_s3 + $0x1c0] sm:$0xf0] }
  0x60   :  { %1015 = vmatpush.bf16.msra.mxu0 %v1514_v18 }
  0x61   :  { %1029 = vmatpush.bf16.msra.mxu1 %v1610_v20  ;;  %v1794_v20 = vor.u32 %v2091_v7, %v1793_v6  ;;  %v1625_v6 = vld [vmem:[%s3067_s3 + $0xe0] sm:$0xf]  ;;  %v2049_v7 = vld [vmem:[%s3067_s3 + $0xe8] sm:$0xf0] }
  0x62   :  { %1043 = vmatpush.bf16.msra.mxu2 %v1706_v29  ;;  %v2112_v29 = vld [vmem:[%s3067_s3 + $0x2e0] sm:$0xf0]  ;;  %v1626_v13 = vor.u32 %v2049_v7, %v1625_v6  ;;  %v2134_v6 = vld [vmem:[%s3070_s5 + $0x90] sm:$0xff] }
  0x63   :  { %1057 = vmatpush.bf16.msra.mxu3 %v1802_v32  ;;  %v1661_v32 = vld [vmem:[%s3067_s3 + $0x128] sm:$0xf] }
  0xa0   :  { %v245_v34 = vpop.f32.mrf.mxu0 }
  0xa1   :  { %v259_v36 = vpop.f32.mrf.mxu1  ;;  %v246_v38 = vadd.f32 %v245_v34, %v62_v35  ;;  %v1782_v34 = vor.u32 %v2088_v25, %v1781_v24  ;;  %v2073_v24 = vld [vmem:[%s3067_s3 + $0x1a8] sm:$0xf0]  ;;  %v1518_v25 = vor.u32 %v2022_v17, %v1517_v16 }
  0xa2   :  { %v260_v39 = vadd.f32 %v259_v36, %v63_v37  ;;  %v1566_v36 = vor.u32 %v2034_v31, %v1565_v30  ;;  %v2123_v30 = vld [vmem:[%s3070_s5 + $0x38] sm:$0xff] }
  0xa3   :  { %v292_v43 = vmax.f32 %v246_v38, 0.0  ;;  %v2085_v38 = vld [vmem:[%s3067_s3 + $0x208] sm:$0xf0] }
  0xa4   :  { %v293_v48 = vmax.f32 %v260_v39, 0.0  ;;  %v1662_v39 = vor.u32 %v2058_v33, %v1661_v32  ;;  %v1709_v33 = vld [vmem:[%s3067_s3 + $0x188] sm:$0xf] }
  0xa8   :  { %v273_v40 = vpop.f32.mrf.mxu2  ;;  %v247_v42 = vpop.f32.mrf.mxu0 }
  0xa9   :  { %v287_v41 = vpop.f32.mrf.mxu3  ;;  %v248_v44 = vadd.f32 %v247_v42, %v62_v35  ;;  %v261_v45 = vpop.f32.mrf.mxu1  ;;  %v274_v61 = vadd.f32 %v273_v40, %v64_v49  ;;  %v1878_v35 = vor.u32 %v2112_v29, %v1877_v26  ;;  %v1865_v40 = vld [vmem:[%s3067_s3 + $0x2c0] sm:$0xf]  ;;  %v1553_v42 = vld [vmem:[%s3067_s3 + $0x50] sm:$0xf]  ;;  %v2097_v29 = vld [vmem:[%s3067_s3 + $0x268] sm:$0xf0] }
  0xaa   :  { %v262_v50 = vadd.f32 %v261_v45, %v63_v37  ;;  %v288_v1 = vadd.f32 %v287_v41, %v65_v53  ;;  %v1769_v37 = vld [vmem:[%s3067_s3 + $0x200] sm:$0xf]  ;;  %v2109_v41 = vld [vmem:[%s3067_s3 + $0x2c8] sm:$0xf0]  ;;  %v2055_v45 = vld [vmem:[%s3067_s3 + $0x118] sm:$0xf0] }
  0xab   :  { %v296_v54 = vmax.f32 %v248_v44, 0.0  ;;  %v294_v14 = vmax.f32 %v274_v61, 0.0  ;;  %v1649_v44 = vld [vmem:[%s3067_s3 + $0x110] sm:$0xf]  ;;  %v1770_v46 = vor.u32 %v2085_v38, %v1769_v37  ;;  %v1866_v47 = vor.u32 %v2109_v41, %v1865_v40  ;;  %v2121_v40 = vld [vmem:[%s3070_s5 + $0x28] sm:$0xff] }
  0xac   :  { %v297_v55 = vmax.f32 %v262_v50, 0.0  ;;  %v295_v18 = vmax.f32 %v288_v1, 0.0  ;;  %v1650_v51 = vor.u32 %v2055_v45, %v1649_v44  ;;  %v1745_v61 = vld [vmem:[%s3067_s3 + $0x1d0] sm:$0xf]  ;;  %v2116_v44 = vld [vmem:[%s3070_s5] sm:$0xff] }
  0xad   :  { %v2780_v57 = vpack.c.bf16 %v296_v54, %v292_v43  ;;  %v2031_v43 = vld [vmem:[%s3067_s3 + $0x58] sm:$0xf0]  ;;  %v1541_v54 = vld [vmem:[%s3067_s3 + $0x38] sm:$0xf]  ;;  %v1746_v8 = vor.u32 %v2079_v63, %v1745_v61  ;;  %v2130_v41 = vld [vmem:[%s3070_s5 + $0x70] sm:$0xff] }
  0xae   :  { %v2788_v62 = vpack.c.bf16 %v297_v55, %v293_v48  ;;  %v1757_v48 = vld [vmem:[%s3067_s3 + $0x1e8] sm:$0xf]  ;;  %v1554_v50 = vor.u32 %v2031_v43, %v1553_v42  ;;  %v2028_v55 = vld [vmem:[%s3067_s3 + $0x40] sm:$0xf0] }
  0xaf   :  { %960 = vmatmul.bf16.vlgmr.msrb.gmra.mxu0 %v2780_v57  ;;  %v1542_v0 = vor.u32 %v2028_v55, %v1541_v54  ;;  %v2117_v42 = vld [vmem:[%s3070_s5 + $0x8] sm:$0xff]  ;;  %v2128_v45 = vld [vmem:[%s3070_s5 + $0x60] sm:$0xff] }
  0xb0   :  { %v275_v2 = vpop.f32.mrf.mxu2  ;;  %974 = vmatmul.bf16.vlgmr.msrb.gmra.mxu1 %v2788_v62  ;;  %1064 = vmatpush.bf16.msrb.mxu0 %v1602_v56  ;;  %v1637_v56 = vld [vmem:[%s3067_s3 + $0xf8] sm:$0xf]  ;;  %v2129_v43 = vld [vmem:[%s3070_s5 + $0x68] sm:$0xff] }
  0xb1   :  { %v276_v3 = vadd.f32 %v275_v2, %v64_v49  ;;  %v289_v4 = vpop.f32.mrf.mxu3  ;;  %1078 = vmatpush.bf16.msrb.mxu1 %v1698_v58  ;;  %v2082_v49 = vld [vmem:[%s3067_s3 + $0x1f0] sm:$0xf0]  ;;  %v2052_v58 = vld [vmem:[%s3067_s3 + $0x100] sm:$0xf0]  ;;  %v1841_v2 = vld [vmem:[%s3067_s3 + $0x290] sm:$0xf] }
  0xb2   :  { %v290_v9 = vadd.f32 %v289_v4, %v65_v53  ;;  %v2106_v53 = vld [vmem:[%s3067_s3 + $0x2b0] sm:$0xf0]  ;;  %v1758_v59 = vor.u32 %v2082_v49, %v1757_v48  ;;  %v1638_v1 = vor.u32 %v2052_v58, %v1637_v56  ;;  %v1529_v4 = vld [vmem:[%s3067_s3 + $0x20] sm:$0xf]  ;;  %v2137_v54 = vld [vmem:[%s3070_s5 + $0xa8] sm:$0xff] }
  0xb3   :  { %v298_v15 = vmax.f32 %v276_v3, 0.0  ;;  %v1854_v60 = vor.u32 %v2106_v53, %v1853_v52  ;;  %v2103_v3 = vld [vmem:[%s3067_s3 + $0x298] sm:$0xf0]  ;;  %v3031_v52 = vld [vmem:[%s3072_s4] sm:$0x7]  ;;  %v2125_v53 = vld [vmem:[%s3070_s5 + $0x48] sm:$0xff] }
  0xb4   :  { %v299_v19 = vmax.f32 %v290_v9, 0.0  ;;  %1065 = vmatpush.bf16.msrb.mxu0 %v1590_v5  ;;  %v2025_v5 = vld [vmem:[%s3067_s3 + $0x28] sm:$0xf0]  ;;  %v1842_v9 = vor.u32 %v2103_v3, %v1841_v2  ;;  %v434_v55 = vperm.slane %v3031_v52, 0  ;;  %v2124_v58 = vld [vmem:[%s3070_s5 + $0x40] sm:$0xff] }
  0xb5   :  { %v2822_v21 = vpack.c.bf16 %v298_v15, %v294_v14  ;;  %1079 = vmatpush.bf16.msrb.mxu1 %v1686_v10  ;;  %v1733_v10 = vld [vmem:[%s3067_s3 + $0x1b8] sm:$0xf]  ;;  %v1530_v12 = vor.u32 %v2025_v5, %v1529_v4  ;;  %v2100_v15 = vld [vmem:[%s3067_s3 + $0x280] sm:$0xf0] }
  0xb6   :  { %v2833_v27 = vpack.c.bf16 %v299_v19, %v295_v18  ;;  %v1829_v14 = vld [vmem:[%s3067_s3 + $0x278] sm:$0xf]  ;;  %v1613_v18 = vld [vmem:[%s3067_s3 + $0xc8] sm:$0xf]  ;;  %v2046_v19 = vld [vmem:[%s3067_s3 + $0xd0] sm:$0xf0] }
  0xb7   :  { %988 = vmatmul.bf16.vlgmr.msrb.gmra.mxu2 %v2822_v21  ;;  %v1614_v26 = vor.u32 %v2046_v19, %v1613_v18  ;;  %v2132_v19 = vld [vmem:[%s3070_s5 + $0x80] sm:$0xff] }
  0xb8   :  { %1002 = vmatmul.bf16.vlgmr.msrb.gmra.mxu3 %v2833_v27  ;;  %1092 = vmatpush.bf16.msrb.mxu2 %v1794_v20  ;;  %v1734_v20 = vor.u32 %v2076_v11, %v1733_v10 }
  0xb9   :  { %1106 = vmatpush.bf16.msrb.mxu3 %v1890_v22  ;;  %1066 = vmatpush.bf16.msrb.mxu0 %v1578_v23  ;;  %v1830_v22 = vor.u32 %v2100_v15, %v1829_v14  ;;  %v1721_v23 = vld [vmem:[%s3067_s3 + $0x1a0] sm:$0xf]  ;;  %v435_v14 = vperm.slane %v3031_v52, 1 }
  0xba   :  { %1080 = vmatpush.bf16.msrb.mxu1 %v1674_v28  ;;  %v1817_v28 = vld [vmem:[%s3067_s3 + $0x260] sm:$0xf]  ;;  %v1722_v31 = vor.u32 %v2073_v24, %v1721_v23 }
  0xbb   :  { %v1818_v32 = vor.u32 %v2097_v29, %v1817_v28 }
  0xbc   :  { %1093 = vmatpush.bf16.msrb.mxu2 %v1782_v34  ;;  %v2070_v34 = vld [vmem:[%s3067_s3 + $0x190] sm:$0xf0] }
  0xbd   :  { %1107 = vmatpush.bf16.msrb.mxu3 %v1878_v35  ;;  %1067 = vmatpush.bf16.msrb.mxu0 %v1566_v36  ;;  %v1805_v35 = vld [vmem:[%s3067_s3 + $0x248] sm:$0xf]  ;;  %v2094_v36 = vld [vmem:[%s3067_s3 + $0x250] sm:$0xf0]  ;;  %v1710_v37 = vor.u32 %v2070_v34, %v1709_v33 }
  0xbe   :  { %1081 = vmatpush.bf16.msrb.mxu1 %v1662_v39  ;;  %v1806_v38 = vor.u32 %v2094_v36, %v1805_v35  ;;  %v2122_v39 = vld [vmem:[%s3070_s5 + $0x30] sm:$0xff]  ;;  %v436_v36 = vperm.slane %v3031_v52, 2 }
  0xbf   :  { %1016 = vmatmul.bf16.vlgmr.msra.gmra.mxu0 %v2780_v57 }
  0xc0   :  { %1094 = vmatpush.bf16.msrb.mxu2 %v1770_v46  ;;  %1030 = vmatmul.bf16.vlgmr.msra.gmra.mxu1 %v2788_v62  ;;  %v2127_v46 = vld [vmem:[%s3070_s5 + $0x58] sm:$0xff] }
  0xc1   :  { %1108 = vmatpush.bf16.msrb.mxu3 %v1866_v47  ;;  %1068 = vmatpush.bf16.msrb.mxu0 %v1554_v50  ;;  %v2139_v47 = vld [vmem:[%s3070_s5 + $0xb8] sm:$0xff]  ;;  %v2126_v50 = vld [vmem:[%s3070_s5 + $0x50] sm:$0xff] }
  0xc2   :  { %1082 = vmatpush.bf16.msrb.mxu1 %v1650_v51  ;;  %v2138_v51 = vld [vmem:[%s3070_s5 + $0xb0] sm:$0xff] }
  0xc4   :  { %1095 = vmatpush.bf16.msrb.mxu2 %v1758_v59  ;;  %v2136_v59 = vld [vmem:[%s3070_s5 + $0xa0] sm:$0xff] }
  0xc5   :  { %1109 = vmatpush.bf16.msrb.mxu3 %v1854_v60  ;;  %1069 = vmatpush.bf16.msrb.mxu0 %v1542_v0 }
  0xc6   :  { %1083 = vmatpush.bf16.msrb.mxu1 %v1638_v1  ;;  %v2135_v1 = vld [vmem:[%s3070_s5 + $0x98] sm:$0xff] }
  0xc7   :  { %1044 = vmatmul.bf16.vlgmr.msra.gmra.mxu2 %v2822_v21 }
  0xc8   :  { %1058 = vmatmul.bf16.vlgmr.msra.gmra.mxu3 %v2833_v27  ;;  %1096 = vmatpush.bf16.msrb.mxu2 %v1746_v8 }
  0xc9   :  { %1110 = vmatpush.bf16.msrb.mxu3 %v1842_v9  ;;  %1070 = vmatpush.bf16.msrb.mxu0 %v1530_v12 }
  0xca   :  { %1084 = vmatpush.bf16.msrb.mxu1 %v1626_v13  ;;  %v2133_v13 = vld [vmem:[%s3070_s5 + $0x88] sm:$0xff] }
  0xcc   :  { %1097 = vmatpush.bf16.msrb.mxu2 %v1734_v20 }
  0xcd   :  { %1111 = vmatpush.bf16.msrb.mxu3 %v1830_v22  ;;  %1071 = vmatpush.bf16.msrb.mxu0 %v1518_v25 }
  0xce   :  { %1085 = vmatpush.bf16.msrb.mxu1 %v1614_v26 }
  0xd0   :  { %1098 = vmatpush.bf16.msrb.mxu2 %v1722_v31  ;;  %1072 = vmatmul.bf16.vlgmr.msrb.gmra.mxu0 %v2780_v57  ;;  %v2120_v57 = vld [vmem:[%s3070_s5 + $0x20] sm:$0xff] }
  0xd1   :  { %1325 = vmatpush.bf16.msra.mxu0 %v2123_v30  ;;  %1112 = vmatpush.bf16.msrb.mxu3 %v1818_v32 }
  0xd2   :  { %1086 = vmatmul.bf16.vlgmr.msrb.gmra.mxu1 %v2788_v62  ;;  %v2119_v62 = vld [vmem:[%s3070_s5 + $0x18] sm:$0xff] }
  0xd4   :  { %1099 = vmatpush.bf16.msrb.mxu2 %v1710_v37 }
  0xd5   :  { %1113 = vmatpush.bf16.msrb.mxu3 %v1806_v38  ;;  %1326 = vmatpush.bf16.msra.mxu0 %v2122_v39 }
  0xd7   :  { %1100 = vmatmul.bf16.vlgmr.msrb.gmra.mxu2 %v2822_v21  ;;  %v2131_v21 = vld [vmem:[%s3070_s5 + $0x78] sm:$0xff] }
  0xd8   :  { %1114 = vmatmul.bf16.vlgmr.msrb.gmra.mxu3 %v2833_v27  ;;  %1339 = vmatpush.bf16.msra.mxu1 %v2131_v21  ;;  %v2118_v27 = vld [vmem:[%s3070_s5 + $0x10] sm:$0xff] }
  0xd9   :  { %1327 = vmatpush.bf16.msra.mxu0 %v2121_v40  ;;  %1353 = vmatpush.bf16.msra.mxu2 %v2139_v47 }
  0xdc   :  { %1340 = vmatpush.bf16.msra.mxu1 %v2130_v41 }
  0xdd   :  { %1328 = vmatpush.bf16.msra.mxu0 %v2120_v57  ;;  %1354 = vmatpush.bf16.msra.mxu2 %v2138_v51 }
  0xe0   :  { %1341 = vmatpush.bf16.msra.mxu1 %v2129_v43 }
  0xe1   :  { %1329 = vmatpush.bf16.msra.mxu0 %v2119_v62  ;;  %1355 = vmatpush.bf16.msra.mxu2 %v2137_v54 }
  0xe4   :  { %1342 = vmatpush.bf16.msra.mxu1 %v2128_v45 }
  0xe5   :  { %1330 = vmatpush.bf16.msra.mxu0 %v2118_v27  ;;  %1356 = vmatpush.bf16.msra.mxu2 %v2136_v59  ;;  %v2145_v59 = vld [vmem:[%s3071_s6] ss:$0 sm:$0xff] }
  0xe8   :  { %1343 = vmatpush.bf16.msra.mxu1 %v2127_v46 }
  0xe9   :  { %1331 = vmatpush.bf16.msra.mxu0 %v2117_v42  ;;  %1357 = vmatpush.bf16.msra.mxu2 %v2135_v1 }
  0xec   :  { %1344 = vmatpush.bf16.msra.mxu1 %v2126_v50 }
  0xed   :  { %1332 = vmatpush.bf16.msra.mxu0 %v2116_v44  ;;  %1358 = vmatpush.bf16.msra.mxu2 %v2134_v6 }
  0xf0   :  { %1345 = vmatpush.bf16.msra.mxu1 %v2125_v53 }
  0xf1   :  { %1359 = vmatpush.bf16.msra.mxu2 %v2133_v13 }
  0xf4   :  { %1346 = vmatpush.bf16.msra.mxu1 %v2124_v58 }
  0xf5   :  { %1360 = vmatpush.bf16.msra.mxu2 %v2132_v19 }
 0x12c   :  { %v961_v48 = vpop.f32.mrf.mxu0 }
 0x12d   :  { %v975_v49 = vpop.f32.mrf.mxu1  ;;  %v962_v61 = vadd.f32 %v961_v48, %v434_v55 }
 0x12f   :  { %v976_v2 = vadd.f32 %v975_v49, %v962_v61 }
 0x134   :  { %v963_v56 = vpop.f32.mrf.mxu0 }
 0x135   :  { %v977_v60 = vpop.f32.mrf.mxu1  ;;  %v964_v3 = vadd.f32 %v963_v56, %v434_v55 }
 0x137   :  { %v978_v7 = vadd.f32 %v977_v60, %v964_v3 }
 0x13a   :  { %v989_v63 = vpop.f32.mrf.mxu2 }
 0x13b   :  { %v1003_v0 = vpop.f32.mrf.mxu3  ;;  %v990_v5 = vadd.f32 %v989_v63, %v976_v2 }
 0x13c   :  { %v1017_v4 = vpop.f32.mrf.mxu0 }
 0x13d   :  { %v1031_v8 = vpop.f32.mrf.mxu1  ;;  %v1004_v10 = vadd.f32 %v1003_v0, %v990_v5  ;;  %v1018_v20 = vadd.f32 %v1017_v4, %v435_v14 }
 0x13f   :  { %v1120_v17 = vmax.f32 %v1004_v10, 0.0  ;;  %v1032_v26 = vadd.f32 %v1031_v8, %v1018_v20 }
 0x142   :  { %v991_v9 = vpop.f32.mrf.mxu2 }
 0x143   :  { %v992_v11 = vadd.f32 %v991_v9, %v978_v7  ;;  %v1005_v12 = vpop.f32.mrf.mxu3 }
 0x144   :  { %v1019_v16 = vpop.f32.mrf.mxu0 }
 0x145   :  { %v1006_v15 = vadd.f32 %v1005_v12, %v992_v11  ;;  %v1033_v25 = vpop.f32.mrf.mxu1  ;;  %v1020_v28 = vadd.f32 %v1019_v16, %v435_v14 }
 0x147   :  { %v1123_v18 = vmax.f32 %v1006_v15, 0.0  ;;  %v1034_v31 = vadd.f32 %v1033_v25, %v1020_v28 }
 0x149   :  { %v1126_v22 = vpack.c.bf16 %v1123_v18, %v1120_v17 }
 0x14a   :  { %v1045_v23 = vpop.f32.mrf.mxu2 }
 0x14b   :  { %v1059_v24 = vpop.f32.mrf.mxu3  ;;  %1333 = vmatmul.bf16.vlgmr.msra.gmra.mxu0 %v1126_v22  ;;  %v1046_v29 = vadd.f32 %v1045_v23, %v1032_v26 }
 0x14d   :  { %v1073_v30 = vpop.f32.mrf.mxu0  ;;  %v1060_v33 = vadd.f32 %v1059_v24, %v1046_v29 }
 0x14e   :  { %v1074_v57 = vadd.f32 %v1073_v30, %v436_v36 }
 0x14f   :  { %v1087_v38 = vpop.f32.mrf.mxu1  ;;  %v1121_v39 = vmax.f32 %v1060_v33, 0.0 }
 0x150   :  { %v1088_v42 = vadd.f32 %v1087_v38, %v1074_v57 }
 0x152   :  { %v1047_v32 = vpop.f32.mrf.mxu2 }
 0x153   :  { %v1048_v34 = vadd.f32 %v1047_v32, %v1034_v31  ;;  %v1061_v35 = vpop.f32.mrf.mxu3 }
 0x155   :  { %v1062_v37 = vadd.f32 %v1061_v35, %v1048_v34  ;;  %v1075_v21 = vpop.f32.mrf.mxu0 }
 0x156   :  { %v1076_v43 = vadd.f32 %v1075_v21, %v436_v36 }
 0x157   :  { %v1124_v40 = vmax.f32 %v1062_v37, 0.0  ;;  %v1089_v45 = vpop.f32.mrf.mxu1 }
 0x158   :  { %v1090_v46 = vadd.f32 %v1089_v45, %v1076_v43 }
 0x159   :  { %v1127_v62 = vpack.c.bf16 %v1124_v40, %v1121_v39 }
 0x15a   :  { %v1101_v27 = vpop.f32.mrf.mxu2 }
 0x15b   :  { %v1115_v41 = vpop.f32.mrf.mxu3  ;;  %1347 = vmatmul.bf16.vlgmr.msra.gmra.mxu1 %v1127_v62  ;;  %v1102_v44 = vadd.f32 %v1101_v27, %v1088_v42 }
 0x15d   :  { %v1116_v48 = vadd.f32 %v1115_v41, %v1102_v44 }
 0x15f   :  { %v1122_v52 = vmax.f32 %v1116_v48, 0.0 }
 0x162   :  { %v1103_v47 = vpop.f32.mrf.mxu2 }
 0x163   :  { %v1104_v49 = vadd.f32 %v1103_v47, %v1090_v46  ;;  %v1117_v50 = vpop.f32.mrf.mxu3 }
 0x165   :  { %v1118_v51 = vadd.f32 %v1117_v50, %v1104_v49 }
 0x167   :  { %v1125_v53 = vmax.f32 %v1118_v51, 0.0 }
 0x169   :  { %v1128_v54 = vpack.c.bf16 %v1125_v53, %v1122_v52 }
 0x16b   :  { %1361 = vmatmul.bf16.vlgmr.msra.gmra.mxu2 %v1128_v54 }
 0x1c8   :  { %v1334_v55 = vpop.f32.mrf.mxu0 }
 0x1c9   :  { %v1335_v63 = vadd.f32 %v2145_v59, %v1334_v55 }
 0x1d0   :  { %v1336_v60 = vpop.f32.mrf.mxu0 }
 0x1d1   :  { %v1337_v0 = vadd.f32 %v2145_v59, %v1336_v60 }
 0x1d8   :  { %v1348_v56 = vpop.f32.mrf.mxu1 }
 0x1d9   :  { %v1349_v1 = vadd.f32 %v1348_v56, %v1335_v63 }
 0x1e0   :  { %v1350_v61 = vpop.f32.mrf.mxu1 }
 0x1e1   :  { %v1351_v2 = vadd.f32 %v1350_v61, %v1337_v0 }
 0x1ee   :  { %v1362_v58 = vpop.f32.mrf.mxu2 }
 0x1ef   :  { %v1363_v4 = vadd.f32 %v1362_v58, %v1349_v1 }
 0x1f6   :  { %v1364_v3 = vpop.f32.mrf.mxu2 }
 0x1f7   :  { %v1365_v5 = vadd.f32 %v1364_v3, %v1351_v2 }
 0x1f9   :  { %v2143_v6 = vpack.c.bf16 %v1365_v5, %v1363_v4 }
 0x1fb   :  { %2144 = vst [vmem:[%s3073_s7] sm:$0xff] %v2143_v6  }

</bundles_post_ra>
